<compile_context>
chip_gen: v7x
topology: tpu7x:2x2x1
jax: 0.10.0
libtpu: 0.0.40
codegen_flags: <defaults>
</compile_context>

<pallas_src>
import functools

import jax
import jax.numpy as jnp
from jax.experimental import pallas as pl
from jax.experimental.pallas import tpu as pltpu

EPS = 1e-5
LANE = 128
SUBLANE = 8


def _round_up(x, m):
    return ((x + m - 1) // m) * m


def _cdiv(a, b):
    return -(-a // b)


def _default_row_tile():
    try:
        kind = jax.devices()[0].device_kind.lower()
    except Exception:
        return 512
    if "v5" in kind:
        return 384      # single vst slot / no bf16 VALU: keep the f32 LN tile smaller
    if "v7" in kind:
        return 1024     # ~3.2 TB/s HBM: larger tiles amortize per-step overhead
    return 512          # v6e default


def _vmem_cap_bytes():
    try:
        cap = int(pltpu.get_tpu_info().vmem_capacity_bytes)
    except Exception:
        cap = 64 * 1024 * 1024   # conservative fallback (v7x per-TC physical VMEM)
    return int(cap * 0.85)       # ~15% compiler headroom


def nplm_block_kernel(x_ref, wt_ref, b_ref, g_ref, beta_ref, o_ref, acc_ref, *,
                      hidden, block_k, mxu_dtype):
    # x_ref:    (TM, Hp)  activation tile (residual + MXU K-slab source, original dtype)
    # wt_ref:   (tk, Hp)  pre-transposed weight block, (in_features, out_features)
    # b_ref:    (1, Hp)   linear bias      (zero in padded lanes)
    # g_ref:    (1, Hp)   layernorm gamma  (zero in padded lanes)
    # beta_ref: (1, Hp)   layernorm beta   (zero in padded lanes)
    # o_ref:    (TM, Hp)  output tile
    # acc_ref:  (TM, Hp)  f32 matmul accumulator (VMEM scratch)
    k = pl.program_id(1)
    nk = pl.num_programs(1)

    @pl.when(k == 0)
    def _():
        acc_ref[...] = jnp.zeros_like(acc_ref)

    # MXU: x[:, k*tk:(k+1)*tk] @ W.T[k*tk:(k+1)*tk, :]. Only the matmul operand is
    # cast to the narrower MXU dtype; the residual/LN path keeps full precision.
    start = pl.multiple_of(k * block_k, LANE)
    xk = x_ref[:, pl.ds(start, block_k)]
    if mxu_dtype is not None:
        xk = xk.astype(mxu_dtype)
    acc_ref[...] += jnp.dot(xk, wt_ref[...], preferred_element_type=jnp.float32)

    @pl.when(k == nk - 1)
    def _():
        x = x_ref[...].astype(jnp.float32)
        h = jnp.tanh(acc_ref[...] + b_ref[...].astype(jnp.float32))
        r = h + x

        # LayerNorm over the valid hidden lanes. Padded lanes of x, padded output
        # columns of W.T and padded bias lanes are all zero, so padded lanes of r are
        # exactly zero: both sums below already equal the valid-lane sums and no lane
        # mask is needed (one-pass var = E[r^2] - mean^2).
        inv_h = 1.0 / float(hidden)
        mean = jnp.sum(r, axis=-1, keepdims=True) * inv_h
        mean_sq = jnp.sum(r * r, axis=-1, keepdims=True) * inv_h
        var = mean_sq - mean * mean
        y = (r - mean) * jax.lax.rsqrt(var + EPS)
        y = y * g_ref[...].astype(jnp.float32) + beta_ref[...].astype(jnp.float32)

        # TODO(synk): nn.Dropout is identity in eval mode; training-mode dropout would
        # need pltpu.prng_seed / pltpu.prng_random_bits for the keep-mask (not done).
        o_ref[...] = y.astype(o_ref.dtype)


def nplm_block_forward(x, weight, bias, gamma, beta, *,
                       tm=None, mxu_dtype=jnp.bfloat16):
    """NPLMBlock forward (eval mode).

    x: (B, S, H). weight: (H, H) torch nn.Linear layout (out_features, in_features).
    bias/gamma/beta: (H,).
    tm: requested row tile (default: per-TPU-generation table).
    mxu_dtype: dtype of the MXU operands (W cast once in the wrapper, the x K-slab
               cast in-kernel); accumulation and the residual/LayerNorm path stay
               f32. Pass None for full-precision matmul operands.
    """
    B, S, H = x.shape
    M = B * S
    out_dtype = x.dtype

    # Lane-dense hidden axis (skip padding entirely when H is already lane-aligned).
    # TODO(synk): for H << 128 (e.g. the demo's H=32) a packed multi-token-per-row
    # layout would avoid the (Hp/H)^2 padded-FLOP blowup; not implemented here.
    Hp = H if H % LANE == 0 else _round_up(H, LANE)

    xb = jnp.dtype(x.dtype).itemsize
    ob = jnp.dtype(out_dtype).itemsize
    wb = jnp.dtype(mxu_dtype if mxu_dtype is not None else weight.dtype).itemsize

    cap = _vmem_cap_bytes()

    # --- K (reduction) tile: largest LANE-multiple divisor of Hp whose
    # double-buffered weight stream fits within ~1/3 of the VMEM budget. ---
    tk = LANE
    for cand in range(Hp, LANE - 1, -LANE):
        if Hp % cand == 0 and 2 * cand * Hp * wb <= max(cap // 3, 2 * LANE * Hp * wb):
            tk = cand
            break

    # --- Balanced row tiling: no near-empty trailing tile. ---
    tm_req = tm if tm is not None else _default_row_tile()
    tm_req = max(SUBLANE, min(_round_up(tm_req, SUBLANE), _round_up(M, SUBLANE)))
    grid_m = _cdiv(M, tm_req)
    tm_eff = _round_up(_cdiv(M, grid_m), SUBLANE)
    Mp = grid_m * tm_eff

    def plan_bytes(tm_, tk_):
        fixed = 2 * tk_ * Hp * wb + 3 * Hp * 4        # W double buffer + b/gamma/beta
        act = 2 * tm_ * Hp * xb + 2 * tm_ * Hp * ob   # double-buffered x / out tiles
        scratch = tm_ * Hp * 4                        # f32 accumulator
        temps = 4 * tm_ * Hp * 4                      # r / y / reduction temporaries
        return fixed + act + scratch + temps

    # Re-tile (shrink tm) if the plan would exceed the VMEM cap — never clamp.
    while plan_bytes(tm_eff, tk) > cap and tm_eff > SUBLANE:
        grid_m = _cdiv(M, max(SUBLANE, _round_up(tm_eff // 2, SUBLANE)))
        tm_eff = _round_up(_cdiv(M, grid_m), SUBLANE)
        Mp = grid_m * tm_eff

    # --- Padding + one-time weight transpose / cast (hoisted out of the kernel). ---
    x2 = x.reshape(M, H)
    if (Mp, Hp) != (M, H):
        x2 = jnp.pad(x2, ((0, Mp - M), (0, Hp - H)))
    w_t = weight.T                                    # (in_features, out_features)
    b_p, g_p, be_p = bias, gamma, beta
    if Hp != H:
        w_t = jnp.pad(w_t, ((0, Hp - H), (0, Hp - H)))
        b_p = jnp.pad(b_p, (0, Hp - H))
        g_p = jnp.pad(g_p, (0, Hp - H))
        be_p = jnp.pad(be_p, (0, Hp - H))
    if mxu_dtype is not None:
        w_t = w_t.astype(mxu_dtype)
    b_p = b_p.reshape(1, Hp)
    g_p = g_p.reshape(1, Hp)
    be_p = be_p.reshape(1, Hp)

    grid = (Mp // tm_eff, Hp // tk)
    kernel = functools.partial(
        nplm_block_kernel, hidden=H, block_k=tk, mxu_dtype=mxu_dtype)

    cost = pl.CostEstimate(
        flops=int(2 * Mp * Hp * Hp),
        transcendentals=int(Mp * Hp),
        bytes_accessed=int(Mp * Hp * (xb + ob) + grid[0] * Hp * Hp * wb + 3 * Hp * 4),
    )

    out2 = pl.pallas_call(
        kernel,
        out_shape=jax.ShapeDtypeStruct((Mp, Hp), out_dtype),
        grid_spec=pltpu.PrefetchScalarGridSpec(
            num_scalar_prefetch=0,
            grid=grid,
            in_specs=[
                # Activation tile: block index constant in k, so only re-fetched when
                # the row tile changes.
                pl.BlockSpec((tm_eff, Hp), lambda i, k: (i, 0)),
                # Pre-transposed weight, streamed along the reduction axis (pipelined).
                pl.BlockSpec((tk, Hp), lambda i, k: (k, 0)),
                # Small params: whole-array VMEM residents (single copy, no per-step
                # streaming or double-buffering).
                pl.BlockSpec(memory_space=pltpu.MemorySpace.VMEM),  # bias
                pl.BlockSpec(memory_space=pltpu.MemorySpace.VMEM),  # gamma
                pl.BlockSpec(memory_space=pltpu.MemorySpace.VMEM),  # beta
            ],
            out_specs=pl.BlockSpec((tm_eff, Hp), lambda i, k: (i, 0)),
            scratch_shapes=[pltpu.VMEM((tm_eff, Hp), jnp.float32)],
        ),
        compiler_params=pltpu.CompilerParams(
            dimension_semantics=("parallel", "arbitrary"),
            vmem_limit_bytes=int(cap),
        ),
        cost_estimate=cost,
    )(x2, w_t, b_p, g_p, be_p)

    if (Mp, Hp) != (M, H):
        out2 = out2[:M, :H]
    return out2.reshape(B, S, H)


def reference_forward(x, weight, bias, gamma, beta):
    h = jnp.tanh(jnp.einsum("bsh,oh->bso", x, weight) + bias)
    r = h + x
    mean = jnp.mean(r, axis=-1, keepdims=True)
    var = jnp.mean((r - mean) ** 2, axis=-1, keepdims=True)
    y = (r - mean) / jnp.sqrt(var + EPS)
    return y * gamma + beta


if __name__ == "__main__":
    batch, seq, hidden = 2, 8, 32
    dropout_p = 0.1  # inert in eval mode

    key = jax.random.PRNGKey(0)
    kx, kw, kb = jax.random.split(key, 3)

    x = jax.random.normal(kx, (batch, seq, hidden), dtype=jnp.float32)

    # Deterministic parameter init (shapes match nn.Linear(H, H) + nn.LayerNorm(H)).
    bound = 1.0 / (hidden ** 0.5)
    weight = jax.random.uniform(
        kw, (hidden, hidden), minval=-bound, maxval=bound, dtype=jnp.float32
    )  # torch Linear weight layout: (out_features, in_features)
    bias = jax.random.uniform(
        kb, (hidden,), minval=-bound, maxval=bound, dtype=jnp.float32
    )
    gamma = jnp.ones((hidden,), dtype=jnp.float32)
    beta = jnp.zeros((hidden,), dtype=jnp.float32)

    ref = reference_forward(x, weight, bias, gamma, beta)

    # Default (performance) path: bf16 MXU operands, f32 accumulation + f32 residual/LN.
    out_bf16 = jax.block_until_ready(nplm_block_forward(x, weight, bias, gamma, beta))
    assert out_bf16.shape == (batch, seq, hidden)
    assert jnp.allclose(out_bf16, ref, atol=5e-2, rtol=5e-2), (
        "bf16-MXU path mismatch vs pure-JAX reference"
    )

    # Full-precision path: strict parity with the PyTorch f32 forward.
    out_f32 = jax.block_until_ready(
        nplm_block_forward(x, weight, bias, gamma, beta, mxu_dtype=None))
    assert jnp.allclose(out_f32, ref, atol=1e-4, rtol=1e-4), (
        "f32 path mismatch vs pure-JAX reference"
    )

    print("KERNEL_OK")
</pallas_src>

<mosaic_0001>
module attributes {stable_mosaic.version = 11 : i64} {
  func.func @nplm_block_kernel(%arg0: i32, %arg1: i32, %arg2: memref<16x128xf32, #tpu.memory_space<vmem>>, %arg3: memref<128x128xbf16, #tpu.memory_space<vmem>>, %arg4: memref<1x128xf32, #tpu.memory_space<vmem>>, %arg5: memref<1x128xf32, #tpu.memory_space<vmem>>, %arg6: memref<1x128xf32, #tpu.memory_space<vmem>>, %arg7: memref<16x128xf32, #tpu.memory_space<vmem>>, %arg8: memref<16x128xf32, #tpu.memory_space<vmem>>) attributes {dimension_semantics = [#tpu.dimension_semantics<parallel>, #tpu.dimension_semantics<arbitrary>], iteration_bounds = array<i64: 1, 1>, scalar_prefetch = 0 : i64, scratch_operands = 1 : i64, tpu.core_type = #tpu.core_type<tc>, window_params = [{transform_indices = @transform_0, window_bounds = array<i64: 16, 128>}, {transform_indices = @transform_1, window_bounds = array<i64: 128, 128>}, {pipeline_mode = #tpu.pipeline_mode<synchronous>, transform_indices = @transform_2, window_bounds = array<i64: 1, 128>}, {pipeline_mode = #tpu.pipeline_mode<synchronous>, transform_indices = @transform_3, window_bounds = array<i64: 1, 128>}, {pipeline_mode = #tpu.pipeline_mode<synchronous>, transform_indices = @transform_4, window_bounds = array<i64: 1, 128>}, {transform_indices = @transform_5, window_bounds = array<i64: 16, 128>}]} {
    %c0_i32 = arith.constant 0 : i32
    %0 = arith.cmpi eq, %arg1, %c0_i32 : i32
    %1 = arith.extui %0 : i1 to i32
    %c0_i32_0 = arith.constant 0 : i32
    %2 = arith.cmpi ne, %1, %c0_i32_0 : i32
    scf.if %2 {
      %cst_9 = arith.constant 0.000000e+00 : f32
      %16 = vector.broadcast %cst_9 : f32 to vector<16x128xf32>
      %c0_10 = arith.constant 0 : index
      %c0_11 = arith.constant 0 : index
      %17 = vector.load %arg8[%c0_10, %c0_11] : memref<16x128xf32, #tpu.memory_space<vmem>>, vector<16x128xf32>
      tpu.vector_store %arg8[%c0_10, %c0_11], %16 {strides = array<i32>} : memref<16x128xf32, #tpu.memory_space<vmem>>, vector<16x128xf32>,
    } else {
    }
    %c128_i32 = arith.constant 128 : i32
    %3 = arith.muli %arg1, %c128_i32 : i32
    %4 = tpu.assume_multiple %3, 128 : i32
    %c0 = arith.constant 0 : index
    %5 = arith.index_cast %4 : i32 to index
    %6 = vector.load %arg2[%c0, %5] : memref<16x128xf32, #tpu.memory_space<vmem>>, vector<16x128xf32>
    %7 = arith.truncf %6 : vector<16x128xf32> to vector<16x128xbf16>
    %c0_1 = arith.constant 0 : index
    %c0_2 = arith.constant 0 : index
    %8 = vector.load %arg8[%c0_1, %c0_2] : memref<16x128xf32, #tpu.memory_space<vmem>>, vector<16x128xf32>
    %c0_3 = arith.constant 0 : index
    %c0_4 = arith.constant 0 : index
    %9 = vector.load %arg3[%c0_3, %c0_4] : memref<128x128xbf16, #tpu.memory_space<vmem>>, vector<128x128xbf16>
    %cst = arith.constant dense<0.000000e+00> : vector<16x128xf32>
    %10 = tpu.matmul %7, %9, %cst {dimension_numbers = #tpu.dot_dimension_numbers<[1], [0], [0], [1], [0, 0, 1, 1], [], []>} : vector<16x128xbf16>, vector<128x128xbf16>, vector<16x128xf32> -> vector<16x128xf32>
    %11 = arith.addf %8, %10 : vector<16x128xf32>
    %c0_5 = arith.constant 0 : index
    %c0_6 = arith.constant 0 : index
    %12 = vector.load %arg8[%c0_5, %c0_6] : memref<16x128xf32, #tpu.memory_space<vmem>>, vector<16x128xf32>
    tpu.vector_store %arg8[%c0_5, %c0_6], %11 {strides = array<i32>} : memref<16x128xf32, #tpu.memory_space<vmem>>, vector<16x128xf32>,
    %c0_i32_7 = arith.constant 0 : i32
    %13 = arith.cmpi eq, %arg1, %c0_i32_7 : i32
    %14 = arith.extui %13 : i1 to i32
    %c0_i32_8 = arith.constant 0 : i32
    %15 = arith.cmpi ne, %14, %c0_i32_8 : i32
    scf.if %15 {
      %c0_9 = arith.constant 0 : index
      %c0_10 = arith.constant 0 : index
      %16 = vector.load %arg2[%c0_9, %c0_10] : memref<16x128xf32, #tpu.memory_space<vmem>>, vector<16x128xf32>
      %c0_11 = arith.constant 0 : index
      %c0_12 = arith.constant 0 : index
      %17 = vector.load %arg8[%c0_11, %c0_12] : memref<16x128xf32, #tpu.memory_space<vmem>>, vector<16x128xf32>
      %c0_13 = arith.constant 0 : index
      %c0_14 = arith.constant 0 : index
      %18 = vector.load %arg4[%c0_13, %c0_14] : memref<1x128xf32, #tpu.memory_space<vmem>>, vector<1x128xf32>
      %19 = vector.broadcast %18 : vector<1x128xf32> to vector<16x128xf32>
      %20 = arith.addf %17, %19 : vector<16x128xf32>
      %21 = math.tanh %20 : vector<16x128xf32>
      %22 = arith.addf %21, %16 : vector<16x128xf32>
      %cst_15 = arith.constant dense<0.000000e+00> : vector<16xf32>
      %23 = vector.multi_reduction <add>, %22, %cst_15 [1] : vector<16x128xf32> to vector<16xf32>
      %24 = vector.shape_cast %23 : vector<16xf32> to vector<16x1xf32>
      %cst_16 = arith.constant 3.125000e-02 : f32
      %25 = vector.broadcast %cst_16 : f32 to vector<16x1xf32>
      %26 = arith.mulf %24, %25 : vector<16x1xf32>
      %27 = arith.mulf %22, %22 : vector<16x128xf32>
      %cst_17 = arith.constant dense<0.000000e+00> : vector<16xf32>
      %28 = vector.multi_reduction <add>, %27, %cst_17 [1] : vector<16x128xf32> to vector<16xf32>
      %29 = vector.shape_cast %28 : vector<16xf32> to vector<16x1xf32>
      %cst_18 = arith.constant 3.125000e-02 : f32
      %30 = vector.broadcast %cst_18 : f32 to vector<16x1xf32>
      %31 = arith.mulf %29, %30 : vector<16x1xf32>
      %32 = arith.mulf %26, %26 : vector<16x1xf32>
      %33 = arith.subf %31, %32 : vector<16x1xf32>
      %34 = vector.broadcast %26 : vector<16x1xf32> to vector<16x128xf32>
      %35 = arith.subf %22, %34 : vector<16x128xf32>
      %cst_19 = arith.constant 9.99999974E-6 : f32
      %36 = vector.broadcast %cst_19 : f32 to vector<16x1xf32>
      %37 = arith.addf %33, %36 : vector<16x1xf32>
      %38 = math.rsqrt %37 : vector<16x1xf32>
      %39 = vector.broadcast %38 : vector<16x1xf32> to vector<16x128xf32>
      %40 = arith.mulf %35, %39 : vector<16x128xf32>
      %c0_20 = arith.constant 0 : index
      %c0_21 = arith.constant 0 : index
      %41 = vector.load %arg5[%c0_20, %c0_21] : memref<1x128xf32, #tpu.memory_space<vmem>>, vector<1x128xf32>
      %42 = vector.broadcast %41 : vector<1x128xf32> to vector<16x128xf32>
      %43 = arith.mulf %40, %42 : vector<16x128xf32>
      %c0_22 = arith.constant 0 : index
      %c0_23 = arith.constant 0 : index
      %44 = vector.load %arg6[%c0_22, %c0_23] : memref<1x128xf32, #tpu.memory_space<vmem>>, vector<1x128xf32>
      %45 = vector.broadcast %44 : vector<1x128xf32> to vector<16x128xf32>
      %46 = arith.addf %43, %45 : vector<16x128xf32>
      %c0_24 = arith.constant 0 : index
      %c0_25 = arith.constant 0 : index
      %47 = vector.load %arg7[%c0_24, %c0_25] : memref<16x128xf32, #tpu.memory_space<vmem>>, vector<16x128xf32>
      tpu.vector_store %arg7[%c0_24, %c0_25], %46 {strides = array<i32>} : memref<16x128xf32, #tpu.memory_space<vmem>>, vector<16x128xf32>,
    } else {
    }
    return
  }
  func.func @transform_0(%arg0: i32, %arg1: i32) -> (i32, i32) {
    %c0_i32 = arith.constant 0 : i32
    %c0_i32_0 = arith.constant 0 : i32
    return %arg0, %c0_i32 : i32, i32
  }
  func.func @transform_1(%arg0: i32, %arg1: i32) -> (i32, i32) {
    %c0_i32 = arith.constant 0 : i32
    %c0_i32_0 = arith.constant 0 : i32
    return %arg1, %c0_i32 : i32, i32
  }
  func.func @transform_2(%arg0: i32, %arg1: i32) -> (i32, i32) {
    %c0_i32 = arith.constant 0 : i32
    %c0_i32_0 = arith.constant 0 : i32
    %c0_i32_1 = arith.constant 0 : i32
    return %c0_i32, %c0_i32_0 : i32, i32
  }
  func.func @transform_3(%arg0: i32, %arg1: i32) -> (i32, i32) {
    %c0_i32 = arith.constant 0 : i32
    %c0_i32_0 = arith.constant 0 : i32
    %c0_i32_1 = arith.constant 0 : i32
    return %c0_i32, %c0_i32_0 : i32, i32
  }
  func.func @transform_4(%arg0: i32, %arg1: i32) -> (i32, i32) {
    %c0_i32 = arith.constant 0 : i32
    %c0_i32_0 = arith.constant 0 : i32
    %c0_i32_1 = arith.constant 0 : i32
    return %c0_i32, %c0_i32_0 : i32, i32
  }
  func.func @transform_5(%arg0: i32, %arg1: i32) -> (i32, i32) {
    %c0_i32 = arith.constant 0 : i32
    %c0_i32_0 = arith.constant 0 : i32
    return %arg0, %c0_i32 : i32, i32
  }
}

</mosaic_0001>

<bundles_post_ra>
// kernel: tpu_custom_call.1
= control target key start
LH: loop header
LB: loop body
LE: loop exit
PB: predicated region body
PF: predicated region fallthrough
CT: control target
= control target key end

     0   :  { %10 = vsyncpa [#allocation4], 0  ;;  %s486_s0 = inlined_call_operand.hbm [shape: f32[16,128], index: 0, kind: input, shape index: {}]   ;;  %s487_s1 = inlined_call_operand.hbm [shape: bf16[128,128], index: 1, kind: input, shape index: {}]   ;;  %s488_s2 = inlined_call_operand.vmem [shape: f32[1,128], index: 2, kind: input, shape index: {}]   ;;  %s489_s3 = inlined_call_operand.vmem [shape: f32[1,128], index: 3, kind: input, shape index: {}]   ;;  %s490_s4 = inlined_call_operand.vmem [shape: f32[1,128], index: 4, kind: input, shape index: {}]   ;;  %s491_s5 = inlined_call_operand.hbm [shape: f32[16,128], index: 5, kind: output, shape index: {}]  }
   0x1   :  { %11 = vsyncpa [#allocation7], 0 }
   0x2   :  { %12 = vsyncpa [#allocation5], 0  ;;  %s396_s18 = smov [#allocation3]   ;;  %s324_s22 = scalar_lea.hbm %s486_s0, 256 }
   0x3   :  { %s18_s19 = sshll.u32 %s396_s18, 4  ;;  %p325_p0 = scmp.ne.s32.totalorder %s486_s0, %s324_s22  ;;  %s19_s19 = int_to_ptr.vmem [resolvable:$true] %s18_s19 }
   0x4   :  { %p328_p1 = scmp.lt.u32.totalorder %s324_s22, %s486_s0 }
   0x6   :  { %p330_p2 = pnand %p328_p1, %p325_p0 }
   0x8   :  { %333 = shalt.err (!%p330_p2)
}
   0x9   :  { %s334_s27 = scalar_lea.vmem %s19_s19, 256  ;;  %p339_p4 = scmp.lt.s32.totalorder %s19_s19, %s19_s19 }
   0xa   :  { %p335_p3 = scmp.ne.s32.totalorder %s19_s19, %s334_s27  ;;  %p340_p5 = scmp.lt.s32.totalorder %s334_s27, %s334_s27 }
   0xc   :  { %p341_p6 = por %p340_p5, %p339_p4 }
   0xe   :  { %p342_p7 = pnand %p341_p6, %p335_p3 }
  0x10   :  { %345 = shalt.err (!%p342_p7)
}
  0x11   :  { %s397_s28 = smov 128   ;;  %s398_s29 = smov 8  }
  0x12   :  { %24 = dma.hbm_to_vmem [thread:$0]  %s486_s0, 256, %s19_s19, [#allocation4], %s397_s28, %s397_s28, %s398_s29  }
  0x13   :  { %s399_s7 = smov [#allocation6]   ;;  %s346_s11 = scalar_lea.hbm %s487_s1, 1024 }
  0x14   :  { %s30_s8 = sshll.u32 %s399_s7, 4  ;;  %p347_p8 = scmp.ne.s32.totalorder %s487_s1, %s346_s11  ;;  %s31_s8 = int_to_ptr.vmem [resolvable:$true] %s30_s8 }
  0x15   :  { %p350_p9 = scmp.lt.u32.totalorder %s346_s11, %s487_s1 }
  0x17   :  { %p352_p10 = pnand %p350_p9, %p347_p8 }
  0x19   :  { %355 = shalt.err (!%p352_p10)
}
  0x1a   :  { %s356_s16 = scalar_lea.vmem %s31_s8, 1024  ;;  %p361_p12 = scmp.lt.s32.totalorder %s31_s8, %s31_s8 }
  0x1b   :  { %p357_p11 = scmp.ne.s32.totalorder %s31_s8, %s356_s16  ;;  %p362_p13 = scmp.lt.s32.totalorder %s356_s16, %s356_s16 }
  0x1d   :  { %p363_p0 = por %p362_p13, %p361_p12 }
  0x1f   :  { %p364_p1 = pnand %p363_p0, %p357_p11 }
  0x21   :  { %367 = shalt.err (!%p364_p1)
}
  0x22   :  { %s400_s0 = smov 64   ;;  %s401_s17 = smov 4  }
  0x23   :  { %36 = dma.hbm_to_vmem [thread:$0]  %s487_s1, 1024, %s31_s8, [#allocation7], %s400_s0, %s400_s0, %s401_s17  }
  0x24   :  { %390 = dma.done.wait [#allocation4], 256  }
  0x25   :  { %391 = vsyncadd [#allocation4], 4294967040 }
  0x26   :  { %392 = dma.done.wait [#allocation7], 1024  }
  0x27   :  { %393 = vsyncadd [#allocation7], 4294966272  ;;  %v402_v0 = vmov 0.0   ;;  %vm403_vm0 = vmmov 0   ;;  %v308_v1 = vld [vmem:[#allocation6] sm:$0xff]   ;;  %v309_v2 = vld [vmem:[#allocation6 + $0x8] sm:$0xff]  }
  0x28   :  { %279 = vmatprep.subr.bf16.mxu0 %v402_v0  ;;  %295 = vmatprep.mubr.msk.bf16.mxu0 %vm403_vm0, %v402_v0  ;;  %v310_v3 = vld [vmem:[#allocation6 + $0x10] sm:$0xff]   ;;  %v311_v4 = vld [vmem:[#allocation6 + $0x18] sm:$0xff]   ;;  %v312_v5 = vld [vmem:[#allocation6 + $0x20] sm:$0xff]   ;;  %s404_s24 = smov [#allocation8]  }
  0x29   :  { %280 = vmatpush3.bf16.msra.mxu0 %v308_v1  ;;  %v313_v6 = vld [vmem:[#allocation6 + $0x28] sm:$0xff]   ;;  %v314_v7 = vld [vmem:[#allocation6 + $0x30] sm:$0xff]   ;;  %v315_v8 = vld [vmem:[#allocation6 + $0x38] sm:$0xff]   ;;  %s245_s25 = sshll.u32 %s404_s24, 4  ;;  %s246_s25 = int_to_ptr.vmem [resolvable:$true] %s245_s25 }
  0x2a   :  { %281 = vmatprep.subr.bf16.mxu0 %v402_v0  ;;  %v60_v9 = vld [vmem:[#allocation3] sm:$0xff]  ;;  %v61_v10 = vld [vmem:[#allocation3 + $0x8] sm:$0xff]  ;;  %s368_s26 = scalar_lea.vmem %s246_s25, 256  ;;  %p373_p3 = scmp.lt.s32.totalorder %s246_s25, %s246_s25 }
  0x2b   :  { %v62_v11 = vpack.c.bf16 %v61_v10, %v60_v9  ;;  %v267_v12 = vld [vmem:[%s488_s2] ss:$0 sm:$0xff]  ;;  %p369_p2 = scmp.ne.s32.totalorder %s246_s25, %s368_s26  ;;  %p374_p4 = scmp.lt.s32.totalorder %s368_s26, %s368_s26 }
  0x2c   :  { %v268_v41 = vld [vmem:[%s489_s3] ss:$0 sm:$0xff] }
  0x2d   :  { %282 = vmatpush3.bf16.msra.mxu0 %v309_v2  ;;  %v269_v43 = vld [vmem:[%s490_s4] ss:$0 sm:$0xff]  ;;  %p375_p5 = por %p374_p4, %p373_p3 }
  0x2e   :  { %283 = vmatprep.subr.bf16.mxu0 %v402_v0 }
  0x2f   :  { %p376_p6 = pnand %p375_p5, %p369_p2 }
  0x31   :  { %284 = vmatpush3.bf16.msra.mxu0 %v310_v3 }
  0x32   :  { %285 = vmatprep.subr.bf16.mxu0 %v402_v0 }
  0x35   :  { %286 = vmatpush3.bf16.msra.mxu0 %v311_v4 }
  0x36   :  { %287 = vmatprep.subr.bf16.mxu0 %v402_v0 }
  0x39   :  { %288 = vmatpush3.bf16.msra.mxu0 %v312_v5 }
  0x3a   :  { %289 = vmatprep.subr.bf16.mxu0 %v402_v0 }
  0x3d   :  { %290 = vmatpush3.bf16.msra.mxu0 %v313_v6 }
  0x3e   :  { %291 = vmatprep.subr.bf16.mxu0 %v402_v0 }
  0x41   :  { %292 = vmatpush3.bf16.msra.mxu0 %v314_v7 }
  0x42   :  { %293 = vmatprep.subr.bf16.mxu0 %v402_v0 }
  0x45   :  { %294 = vmatpush3.bf16.msra.mxu0 %v315_v8 }
  0x48   :  { %296 = vmatmul.mubr.bf16.vlgmr.msra.gmra.mrb[0].mxu0 %v62_v11 }
 0x11b   :  { %v163_v13 = vpop.f32.mrb[0].mxu0 }
 0x11c   :  { %v188_v14 = vadd.f32 %v267_v12, %v163_v13  ;;  %v297_v15 = vpop.f32.mrb[1].mxu0 }
 0x11d   :  { %v166_v16 = vpop.f32.mrb[2].mxu0 }
 0x11e   :  { %316 = vtanh.f32 %v188_v14  ;;  %v189_v17 = vadd.f32 %v267_v12, %v166_v16  ;;  %v298_v18 = vpop.f32.mrb[3].mxu0 }
 0x120   :  { %318 = vtanh.f32 %v189_v17 }
 0x128   :  { %v317_v19 = vpop.eup %316 }
 0x129   :  { %v192_v20 = vadd.f32 %v317_v19, %v60_v9 }
 0x12a   :  { %v319_v21 = vpop.eup %318 }
 0x12b   :  { %194 = vadd.xlane.f32.xlu0 %v192_v20  ;;  %v200_v22 = vmul.f32 %v192_v20, %v192_v20  ;;  %v193_v23 = vadd.f32 %v319_v21, %v61_v10 }
 0x12d   :  { %202 = vadd.xlane.f32.xlu1 %v200_v22  ;;  %v201_v24 = vmul.f32 %v193_v23, %v193_v23 }
 0x12f   :  { %196 = vadd.xlane.f32.xlu0 %v193_v23 }
 0x131   :  { %204 = vadd.xlane.f32.xlu1 %v201_v24 }
 0x1b8   :  { %v195_v25 = vpop.xlane.xlu0 %194 }
 0x1b9   :  { %v198_v26 = vmul.f32 0.03125, %v195_v25 }
 0x1ba   :  { %v203_v27 = vpop.xlane.xlu1 %202 }
 0x1bb   :  { %v208_v28 = vmul.f32 %v198_v26, %v198_v26  ;;  %v206_v29 = vmul.f32 0.03125, %v203_v27  ;;  %v212_v39 = vsub.f32 %v192_v20, %v198_v26 }
 0x1bc   :  { %v197_v30 = vpop.xlane.xlu0 %196 }
 0x1bd   :  { %v210_v31 = vsub.f32 %v206_v29, %v208_v28  ;;  %v199_v32 = vmul.f32 0.03125, %v197_v30 }
 0x1be   :  { %v205_v33 = vpop.xlane.xlu1 %204 }
 0x1bf   :  { %v214_v34 = vadd.f32 1e-05, %v210_v31  ;;  %v209_v35 = vmul.f32 %v199_v32, %v199_v32  ;;  %v207_v36 = vmul.f32 0.03125, %v205_v33  ;;  %v213_v44 = vsub.f32 %v193_v23, %v199_v32 }
 0x1c1   :  { %320 = vrsqrt.f32 %v214_v34  ;;  %v211_v37 = vsub.f32 %v207_v36, %v209_v35 }
 0x1c3   :  { %v215_v38 = vadd.f32 1e-05, %v211_v37 }
 0x1c5   :  { %322 = vrsqrt.f32 %v215_v38 }
 0x1cb   :  { %v321_v40 = vpop.eup %320 }
 0x1cc   :  { %v218_v42 = vmul.f32 %v321_v40, %v212_v39 }
 0x1ce   :  { %v227_v45 = vmul.f32 %v268_v41, %v218_v42 }
 0x1cf   :  { %v323_v46 = vpop.eup %322 }
 0x1d0   :  { %v219_v47 = vmul.f32 %v323_v46, %v213_v44  ;;  %v236_v48 = vadd.f32 %v269_v43, %v227_v45 }
 0x1d2   :  { %v228_v49 = vmul.f32 %v268_v41, %v219_v47  ;;  %238 = vst [vmem:[#allocation8] sm:$0xff] %v236_v48 }
 0x1d4   :  { %v237_v50 = vadd.f32 %v269_v43, %v228_v49 }
 0x1d6   :  { %239 = vst [vmem:[#allocation8 + $0x8] sm:$0xff] %v237_v50 }
 0x1d7   :  { %379 = shalt.err (!%p376_p6)
}
 0x1d8   :  { %s380_s27 = scalar_lea.hbm %s491_s5, 256 }
 0x1d9   :  { %p381_p7 = scmp.ne.s32.totalorder %s491_s5, %s380_s27  ;;  %p384_p8 = scmp.lt.u32.totalorder %s380_s27, %s491_s5 }
 0x1db   :  { %p386_p9 = pnand %p384_p8, %p381_p7 }
 0x1dd   :  { %389 = shalt.err (!%p386_p9)
}
 0x1de   :  { %251 = dma.vmem_to_hbm [thread:$0]  %s246_s25, 256, %s491_s5, [#allocation5], %s397_s28, %s397_s28, %s398_s29  }
 0x1df   :  { %394 = dma.done.wait [#allocation5], 256  }
 0x1e0   :  { %395 = vsyncadd [#allocation5], 4294967040 }
 0x1e1   :  { %255 = vsyncpa [#allocation4], 1 }
 0x1e2   :  { %256 = vsyncpa [#allocation7], 1 }
 0x1e3   :  { %257 = vsyncpa [#allocation5], 1 }

</bundles_post_ra>
